<compile_context>
chip_gen: v5e
topology: v5e:2x2
jax: 0.10.0
libtpu: 0.0.40
codegen_flags: <defaults>
</compile_context>

<pallas_src>
import functools
import math

import jax
import jax.numpy as jnp
from jax.experimental import pallas as pl
from jax.experimental.pallas import tpu as pltpu


# ----------------------------------------------------------------------------
# Fused kernel
# ----------------------------------------------------------------------------
def _fused_loss_kernel(*refs, has_decoder, num_groups, entropy, var, norm):
    if has_decoder:
        (preds_ref, dec_ref, labels_ref, gates_ref,
         acc_p_ref, acc_d_ref, acc_kl_ref, sp_ref) = refs
    else:
        preds_ref, labels_ref, gates_ref, acc_p_ref, sp_ref = refs
        dec_ref = acc_d_ref = acc_kl_ref = None

    j = pl.program_id(1)  # batch-tile axis ("arbitrary"); axis 0 is the core split

    @pl.when(j == 0)
    def _init():
        # Zero per-core accumulators (output blocks stay resident in VMEM
        # across the whole j loop because their block index depends only on c).
        acc_p_ref[...] = jnp.zeros_like(acc_p_ref)
        if has_decoder:
            acc_d_ref[...] = jnp.zeros_like(acc_d_ref)
            acc_kl_ref[...] = jnp.zeros_like(acc_kl_ref)

        # --- fused sparsity / flops surrogate (gates is tiny: (G, Dg)) -------
        g = gates_ref[...].astype(jnp.float32)
        dg = g.shape[-1]
        mg = jnp.max(g, axis=-1, keepdims=True)
        zg = g - mg
        eg = jnp.exp(zg)
        sg = jnp.sum(eg, axis=-1, keepdims=True)
        lg = zg - jnp.log(sg)                        # log_softmax(gates)
        pg = eg * pl.reciprocal(sg, approx=False)    # softmax without a 2nd exp
        loss_rows = jnp.zeros_like(pg)               # per-lane partials; wrapper
        if entropy:                                  # finishes the lane reduce
            ent = -pg * lg
            if norm:
                ent = ent * (1.0 / math.log(float(dg)))
            loss_rows = loss_rows + ent
        if var:
            mean_pg = jnp.mean(pg, axis=-1, keepdims=True)
            loss_rows = loss_rows - (pg - mean_pg) ** 2   # lane-sum == var * dg
        sig_row = jnp.sum(jax.nn.sigmoid(g), axis=0, keepdims=True)  # keep-ratio partial
        rows = [loss_rows, sig_row]
        if num_groups + 1 < 8:
            rows.append(jnp.zeros((8 - num_groups - 1, dg), jnp.float32))
        sp_ref[...] = jnp.concatenate(rows, axis=0)[None]

    # --- batch-tile CE / KL partial sums (lane-dense, batch axis reduced) ----
    x = preds_ref[...].astype(jnp.float32)           # (tb, C), f32 compute (v5e-safe)
    tb, ncls = x.shape
    lab = labels_ref[...]                            # (tb, 1) int32; -1 marks pad rows
    col = jax.lax.broadcasted_iota(jnp.int32, (tb, ncls), 1)
    at_label = col == lab                            # in-kernel "one hot", no HBM stream

    mx = jnp.max(x, axis=-1, keepdims=True)
    zx = x - mx
    ex = jnp.exp(zx)
    sx = jnp.sum(ex, axis=-1, keepdims=True)
    lp = zx - jnp.log(sx)                            # log_softmax(preds)

    acc_p_ref[...] += jnp.sum(jnp.where(at_label, -lp, 0.0),
                              axis=0, keepdims=True)[None]

    if has_decoder:
        d = dec_ref[...].astype(jnp.float32)
        md = jnp.max(d, axis=-1, keepdims=True)
        zd = d - md
        ed = jnp.exp(zd)
        sd = jnp.sum(ed, axis=-1, keepdims=True)
        ld = zd - jnp.log(sd)                        # log_softmax(decoder_pred)
        # softmax(preds) from the already-computed exp: saves a 3rd full-tile exp.
        p = ex * pl.reciprocal(sx, approx=False)
        acc_d_ref[...] += jnp.sum(jnp.where(at_label, -ld, 0.0),
                                  axis=0, keepdims=True)[None]
        acc_kl_ref[...] += jnp.sum(p * (lp - ld), axis=0, keepdims=True)[None]


# ----------------------------------------------------------------------------
# Tile selection + wrapper
# ----------------------------------------------------------------------------
def _pick_tb(batch, ncls, n_streams, itemsize):
    """Largest batch tile (multiple of 16, <=512) whose double-buffered input
    streams fit in ~40 MiB of VMEM (leaves headroom on v7x's 64 MiB)."""
    budget = 40 * 1024 * 1024
    per_row = n_streams * 2 * ncls * itemsize + 2 * 4   # activations + labels
    tb = min(512, max(16, budget // per_row))
    tb = max(16, (int(tb) // 16) * 16)
    b_pad16 = ((batch + 15) // 16) * 16
    return min(tb, b_pad16)


def _fused_sums_pallas(preds, dec, labels, gates, *, entropy, var, norm, tb=None):
    batch, ncls = preds.shape
    num_groups, gdim = gates.shape
    assert num_groups + 1 <= 8, "gate groups + keep-ratio row must fit 8 sublanes"
    has_decoder = dec is not None
    n_streams = 2 if has_decoder else 1
    itemsize = jnp.dtype(preds.dtype).itemsize

    if tb is None:
        tb = _pick_tb(batch, ncls, n_streams, itemsize)
    tb = max(16, (int(tb) // 16) * 16)       # multiple of 16: bf16 sublane packing safe

    steps_total = -(-batch // tb)
    num_cores = 2 if steps_total >= 2 else 1   # v7x: 2 TCs; harmless loop split elsewhere
    steps_per_core = -(-steps_total // num_cores)
    batch_pad = num_cores * steps_per_core * tb

    labels2d = labels.reshape(batch, 1).astype(jnp.int32)
    if batch_pad != batch:
        pad = batch_pad - batch
        preds = jnp.pad(preds, ((0, pad), (0, 0)))
        if has_decoder:
            dec = jnp.pad(dec, ((0, pad), (0, 0)))
        # label -1 never matches the class iota -> padded rows add 0 CE; zero-padded
        # preds/dec rows give identical log-softmax -> 0 KL contribution.
        labels2d = jnp.pad(labels2d, ((0, pad), (0, 0)), constant_values=-1)

    row_spec = pl.BlockSpec((tb, ncls), lambda c, j: (c * steps_per_core + j, 0))
    lab_spec = pl.BlockSpec((tb, 1), lambda c, j: (c * steps_per_core + j, 0))
    gate_spec = pl.BlockSpec((num_groups, gdim), lambda c, j: (0, 0))
    acc_spec = pl.BlockSpec((1, 1, ncls), lambda c, j: (c, 0, 0))
    sp_spec = pl.BlockSpec((1, 8, gdim), lambda c, j: (c, 0, 0))

    kernel = functools.partial(
        _fused_loss_kernel, has_decoder=has_decoder, num_groups=num_groups,
        entropy=entropy, var=var, norm=norm)

    acc_shape = jax.ShapeDtypeStruct((num_cores, 1, ncls), jnp.float32)
    sp_shape = jax.ShapeDtypeStruct((num_cores, 8, gdim), jnp.float32)
    if has_decoder:
        in_specs = [row_spec, row_spec, lab_spec, gate_spec]
        out_shape = [acc_shape, acc_shape, acc_shape, sp_shape]
        out_specs = [acc_spec, acc_spec, acc_spec, sp_spec]
        args = (preds, dec, labels2d, gates)
    else:
        in_specs = [row_spec, lab_spec, gate_spec]
        out_shape = [acc_shape, sp_shape]
        out_specs = [acc_spec, sp_spec]
        args = (preds, labels2d, gates)

    cost = pl.CostEstimate(
        flops=int(12 * n_streams * batch_pad * ncls),
        transcendentals=int(n_streams * batch_pad * ncls + 4 * batch_pad),
        bytes_accessed=int(n_streams * batch_pad * ncls * itemsize
                           + batch_pad * 4
                           + (3 * ncls + 8 * gdim) * num_cores * 4),
    )

    outs = pl.pallas_call(
        kernel,
        out_shape=out_shape,
        grid_spec=pltpu.PrefetchScalarGridSpec(
            num_scalar_prefetch=0,
            grid=(num_cores, steps_per_core),
            in_specs=in_specs,
            out_specs=out_specs,
        ),
        compiler_params=pltpu.CompilerParams(
            dimension_semantics=("parallel", "arbitrary"),
            vmem_limit_bytes=48 * 1024 * 1024,   # > default scoped limit, < v7x physical
        ),
        cost_estimate=cost,
    )(*args)

    if has_decoder:
        acc_p, acc_d, acc_kl, sp = outs
        ce_p, ce_d, kl = jnp.sum(acc_p), jnp.sum(acc_d), jnp.sum(acc_kl)
    else:
        acc_p, sp = outs
        ce_p, ce_d, kl = jnp.sum(acc_p), None, None

    sp0 = sp[0]                                     # each core writes identical values
    grp = jnp.sum(sp0[:num_groups, :], axis=-1)     # (G,) per-group sparsity terms
    keep_ratio = jnp.sum(sp0[num_groups, :]) / (num_groups * gdim)
    return ce_p, ce_d, kl, grp, keep_ratio


# ----------------------------------------------------------------------------
# Plain-XLA fallback for lane-sparse class dims (C < 128): a Pallas launch would
# run on mostly-empty vregs and lose to XLA's fused reduction there.
# ----------------------------------------------------------------------------
def _sums_xla(preds, dec, labels, gates, *, entropy, var, norm):
    _, ncls = preds.shape
    lp = jax.nn.log_softmax(preds.astype(jnp.float32), axis=-1)
    oh = jax.nn.one_hot(labels, ncls, dtype=jnp.float32)
    ce_p = jnp.sum(-oh * lp)
    if dec is not None:
        ld = jax.nn.log_softmax(dec.astype(jnp.float32), axis=-1)
        ce_d = jnp.sum(-oh * ld)
        kl = jnp.sum(jnp.exp(lp) * (lp - ld))
    else:
        ce_d = kl = None

    g = gates.astype(jnp.float32)
    num_groups, gdim = g.shape
    lg = jax.nn.log_softmax(g, axis=-1)
    pg = jnp.exp(lg)
    grp = jnp.zeros((num_groups,), jnp.float32)
    if entropy:
        ent = -jnp.sum(pg * lg, axis=-1)
        if norm:
            ent = ent / jnp.log(jnp.float32(gdim))
        grp = grp + ent
    if var:
        grp = grp - jnp.var(pg, axis=-1) * gdim
    keep_ratio = jnp.mean(jax.nn.sigmoid(g))
    return ce_p, ce_d, kl, grp, keep_ratio


# ----------------------------------------------------------------------------
# OFBSearchLOSS.forward equivalent
# ----------------------------------------------------------------------------
def ofb_search_loss_forward(inputs, outputs, labels, arch_gates, phase,
                            target_flops=1.0, finish_search=False,
                            attn_w=1e-4, mlp_w=1e-4, patch_w=1e-4,
                            embedding_w=1e-4, flops_w=1e-4,
                            entropy=True, var=True, norm=True, tb=None):
    del inputs  # base_criterion here (soft-target CE) ignores the raw inputs
    if isinstance(outputs, tuple):
        preds, decoder_pred = outputs
    else:
        preds, decoder_pred = outputs, None
    batch, ncls = preds.shape

    if ncls >= 128:
        ce_p, ce_d, kl, grp, keep_ratio = _fused_sums_pallas(
            preds, decoder_pred, labels, arch_gates,
            entropy=entropy, var=var, norm=norm, tb=tb)
    else:
        ce_p, ce_d, kl, grp, keep_ratio = _sums_xla(
            preds, decoder_pred, labels, arch_gates,
            entropy=entropy, var=var, norm=norm)

    if decoder_pred is not None:
        # base = CE(preds); decoder_pred_loss = CE(dec) + batchmean KL; base += it
        base_loss = (ce_p + ce_d + kl) / batch
    else:
        base_loss = ce_p / batch

    if (not finish_search) and ("arch" in phase):
        loss_flops = (keep_ratio - jnp.float32(target_flops)) ** 2
        sparsity_loss = (attn_w * grp[0] + mlp_w * grp[1] + patch_w * grp[2]
                         + embedding_w * grp[3] + flops_w * loss_flops)
        return base_loss, sparsity_loss
    return base_loss


# ----------------------------------------------------------------------------
# Pure-JAX reference for correctness checking
# ----------------------------------------------------------------------------
def _reference(preds, dec, labels, gates, target_flops, ws):
    batch, ncls = preds.shape
    oh = jax.nn.one_hot(labels, ncls, dtype=jnp.float32)
    lp = jax.nn.log_softmax(preds.astype(jnp.float32), axis=-1)
    ce_p = jnp.mean(jnp.sum(-oh * lp, axis=-1))
    if dec is not None:
        ld = jax.nn.log_softmax(dec.astype(jnp.float32), axis=-1)
        ce_d = jnp.mean(jnp.sum(-oh * ld, axis=-1))
        kl = jnp.sum(jnp.exp(lp) * (lp - ld)) / batch
        base = ce_p + ce_d + kl
    else:
        base = ce_p

    g = gates.astype(jnp.float32)
    d = g.shape[-1]
    lg = jax.nn.log_softmax(g, axis=-1)
    pg = jnp.exp(lg)
    ent = -jnp.sum(pg * lg, axis=-1) / jnp.log(jnp.float32(d))
    v = jnp.var(pg, axis=-1) * d
    grp = ent - v
    fl = (jnp.mean(jax.nn.sigmoid(g)) - target_flops) ** 2
    w1, w2, w3, w4, w5 = ws
    sp = w1 * grp[0] + w2 * grp[1] + w3 * grp[2] + w4 * grp[3] + w5 * fl
    return base, sp


if __name__ == "__main__":
    key = jax.random.PRNGKey(0)
    k1, k2, k3, k4, k5, k6, k7 = jax.random.split(key, 7)

    ws = (1e-4, 1e-4, 1e-4, 1e-4, 1e-4)
    target_flops = 0.5

    # ---- case 1: lane-dense head, decoder present, arch phase --------------
    B, C, G_DIM = 32, 128, 128
    preds = jax.random.normal(k1, (B, C), dtype=jnp.float32)
    decoder_pred = jax.random.normal(k2, (B, C), dtype=jnp.float32)
    labels = jax.random.randint(k3, (B,), 0, C)
    inputs = jnp.zeros((B, 4, 16, 16), jnp.float32)          # unused by the criterion
    arch_gates = jax.random.normal(k4, (4, G_DIM), dtype=jnp.float32)

    base_loss, sparsity_loss = ofb_search_loss_forward(
        inputs, (preds, decoder_pred), labels, arch_gates, phase="arch_search",
        target_flops=target_flops, finish_search=False,
        attn_w=ws[0], mlp_w=ws[1], patch_w=ws[2], embedding_w=ws[3], flops_w=ws[4])
    base_loss = jax.block_until_ready(base_loss)
    sparsity_loss = jax.block_until_ready(sparsity_loss)

    ref_base, ref_sp = _reference(preds, decoder_pred, labels, arch_gates,
                                  target_flops, ws)
    assert jnp.allclose(base_loss, ref_base, rtol=1e-4, atol=1e-4), (base_loss, ref_base)
    assert jnp.allclose(sparsity_loss, ref_sp, rtol=1e-4, atol=1e-7), (sparsity_loss, ref_sp)

    # ---- case 2: non-arch phase returns just the base loss -----------------
    base_only = jax.block_until_ready(
        ofb_search_loss_forward(inputs, (preds, decoder_pred), labels, arch_gates,
                                phase="weight", target_flops=target_flops))
    assert jnp.allclose(base_only, ref_base, rtol=1e-4, atol=1e-4)

    # ---- case 3: ragged batch + forced small tile -> multi-step grid,
    #              2-way parallel core axis, zero-padded remainder tile -------
    B2 = 72
    preds2 = jax.random.normal(k5, (B2, C), dtype=jnp.float32)
    dec2 = jax.random.normal(k6, (B2, C), dtype=jnp.float32)
    labels2 = jax.random.randint(k7, (B2,), 0, C)
    bl2, sl2 = ofb_search_loss_forward(
        jnp.zeros((B2, 4, 16, 16), jnp.float32), (preds2, dec2), labels2,
        arch_gates, phase="arch", target_flops=target_flops, tb=16)
    bl2 = jax.block_until_ready(bl2)
    sl2 = jax.block_until_ready(sl2)
    rb2, rs2 = _reference(preds2, dec2, labels2, arch_gates, target_flops, ws)
    assert jnp.allclose(bl2, rb2, rtol=1e-4, atol=1e-4), (bl2, rb2)
    assert jnp.allclose(sl2, rs2, rtol=1e-4, atol=1e-7), (sl2, rs2)

    # ---- case 4: single-output (no decoder) path ----------------------------
    b_single = jax.block_until_ready(
        ofb_search_loss_forward(inputs, preds, labels, arch_gates,
                                phase="weight", target_flops=target_flops))
    rb_single, _ = _reference(preds, None, labels, arch_gates, target_flops, ws)
    assert jnp.allclose(b_single, rb_single, rtol=1e-4, atol=1e-4)

    print("KERNEL_OK")
</pallas_src>

<mosaic_0001>
module attributes {stable_mosaic.version = 11 : i64} {
  func.func @_fused_loss_kernel(%arg0: i32, %arg1: i32, %arg2: memref<32x128xf32, #tpu.memory_space<vmem>>, %arg3: memref<32x128xf32, #tpu.memory_space<vmem>>, %arg4: memref<32x1xi32, #tpu.memory_space<vmem>>, %arg5: memref<4x128xf32, #tpu.memory_space<vmem>>, %arg6: memref<1x1x128xf32, #tpu.memory_space<vmem>>, %arg7: memref<1x1x128xf32, #tpu.memory_space<vmem>>, %arg8: memref<1x1x128xf32, #tpu.memory_space<vmem>>, %arg9: memref<1x8x128xf32, #tpu.memory_space<vmem>>) attributes {dimension_semantics = [#tpu.dimension_semantics<parallel>, #tpu.dimension_semantics<arbitrary>], iteration_bounds = array<i64: 1, 1>, scalar_prefetch = 0 : i64, scratch_operands = 0 : i64, tpu.core_type = #tpu.core_type<tc>, window_params = [{transform_indices = @transform_0, window_bounds = array<i64: 32, 128>}, {transform_indices = @transform_1, window_bounds = array<i64: 32, 128>}, {transform_indices = @transform_2, window_bounds = array<i64: 32, 1>}, {pipeline_mode = #tpu.pipeline_mode<synchronous>, transform_indices = @transform_3, window_bounds = array<i64: 4, 128>}, {transform_indices = @transform_4, window_bounds = array<i64: 1, 1, 128>}, {transform_indices = @transform_5, window_bounds = array<i64: 1, 1, 128>}, {transform_indices = @transform_6, window_bounds = array<i64: 1, 1, 128>}, {transform_indices = @transform_7, window_bounds = array<i64: 1, 8, 128>}]} {
    %c0_i32 = arith.constant 0 : i32
    %0 = arith.cmpi eq, %arg1, %c0_i32 : i32
    %1 = arith.extui %0 : i1 to i32
    %c0_i32_0 = arith.constant 0 : i32
    %2 = arith.cmpi ne, %1, %c0_i32_0 : i32
    scf.if %2 {
      %cst_34 = arith.constant 0.000000e+00 : f32
      %60 = vector.broadcast %cst_34 : f32 to vector<1x1x128xf32>
      %c0_35 = arith.constant 0 : index
      %c0_36 = arith.constant 0 : index
      %c0_37 = arith.constant 0 : index
      %61 = vector.load %arg6[%c0_35, %c0_36, %c0_37] : memref<1x1x128xf32, #tpu.memory_space<vmem>>, vector<1x1x128xf32>
      tpu.vector_store %arg6[%c0_35, %c0_36, %c0_37], %60 {strides = array<i32>} : memref<1x1x128xf32, #tpu.memory_space<vmem>>, vector<1x1x128xf32>,
      %cst_38 = arith.constant 0.000000e+00 : f32
      %62 = vector.broadcast %cst_38 : f32 to vector<1x1x128xf32>
      %c0_39 = arith.constant 0 : index
      %c0_40 = arith.constant 0 : index
      %c0_41 = arith.constant 0 : index
      %63 = vector.load %arg7[%c0_39, %c0_40, %c0_41] : memref<1x1x128xf32, #tpu.memory_space<vmem>>, vector<1x1x128xf32>
      tpu.vector_store %arg7[%c0_39, %c0_40, %c0_41], %62 {strides = array<i32>} : memref<1x1x128xf32, #tpu.memory_space<vmem>>, vector<1x1x128xf32>,
      %cst_42 = arith.constant 0.000000e+00 : f32
      %64 = vector.broadcast %cst_42 : f32 to vector<1x1x128xf32>
      %c0_43 = arith.constant 0 : index
      %c0_44 = arith.constant 0 : index
      %c0_45 = arith.constant 0 : index
      %65 = vector.load %arg8[%c0_43, %c0_44, %c0_45] : memref<1x1x128xf32, #tpu.memory_space<vmem>>, vector<1x1x128xf32>
      tpu.vector_store %arg8[%c0_43, %c0_44, %c0_45], %64 {strides = array<i32>} : memref<1x1x128xf32, #tpu.memory_space<vmem>>, vector<1x1x128xf32>,
      %c0_46 = arith.constant 0 : index
      %c0_47 = arith.constant 0 : index
      %66 = vector.load %arg5[%c0_46, %c0_47] : memref<4x128xf32, #tpu.memory_space<vmem>>, vector<4x128xf32>
      %cst_48 = arith.constant dense<0xFF800000> : vector<4xf32>
      %67 = vector.multi_reduction <maximumf>, %66, %cst_48 [1] : vector<4x128xf32> to vector<4xf32>
      %68 = vector.shape_cast %67 : vector<4xf32> to vector<4x1xf32>
      %69 = vector.broadcast %68 : vector<4x1xf32> to vector<4x128xf32>
      %70 = arith.subf %66, %69 : vector<4x128xf32>
      %71 = math.exp %70 : vector<4x128xf32>
      %cst_49 = arith.constant dense<0.000000e+00> : vector<4xf32>
      %72 = vector.multi_reduction <add>, %71, %cst_49 [1] : vector<4x128xf32> to vector<4xf32>
      %73 = vector.shape_cast %72 : vector<4xf32> to vector<4x1xf32>
      %74 = math.log %73 : vector<4x1xf32>
      %75 = vector.broadcast %74 : vector<4x1xf32> to vector<4x128xf32>
      %76 = arith.subf %70, %75 : vector<4x128xf32>
      %77 = tpu.reciprocal %73 : vector<4x1xf32> -> vector<4x1xf32>
      %78 = vector.broadcast %77 : vector<4x1xf32> to vector<4x128xf32>
      %79 = arith.mulf %71, %78 : vector<4x128xf32>
      %cst_50 = arith.constant 0.000000e+00 : f32
      %80 = vector.broadcast %cst_50 : f32 to vector<4x128xf32>
      %cst_51 = arith.constant 0.000000e+00 : f32
      %81 = vector.broadcast %cst_51 : f32 to vector<4x128xf32>
      %82 = arith.subf %81, %79 : vector<4x128xf32>
      %83 = arith.mulf %82, %76 : vector<4x128xf32>
      %cst_52 = arith.constant 0.206099287 : f32
      %84 = vector.broadcast %cst_52 : f32 to vector<4x128xf32>
      %85 = arith.mulf %83, %84 : vector<4x128xf32>
      %86 = arith.addf %80, %85 : vector<4x128xf32>
      %cst_53 = arith.constant dense<0.000000e+00> : vector<4xf32>
      %87 = vector.multi_reduction <add>, %79, %cst_53 [1] : vector<4x128xf32> to vector<4xf32>
      %88 = vector.shape_cast %87 : vector<4xf32> to vector<4x1xf32>
      %cst_54 = arith.constant 1.280000e+02 : f32
      %89 = vector.broadcast %cst_54 : f32 to vector<4x1xf32>
      %90 = arith.divf %88, %89 : vector<4x1xf32>
      %91 = vector.broadcast %90 : vector<4x1xf32> to vector<4x128xf32>
      %92 = arith.subf %79, %91 : vector<4x128xf32>
      %93 = arith.mulf %92, %92 : vector<4x128xf32>
      %94 = arith.subf %86, %93 : vector<4x128xf32>
      %95 = arith.negf %66 : vector<4x128xf32>
      %96 = math.exp %95 : vector<4x128xf32>
      %cst_55 = arith.constant 1.000000e+00 : f32
      %97 = vector.broadcast %cst_55 : f32 to vector<4x128xf32>
      %98 = arith.addf %97, %96 : vector<4x128xf32>
      %99 = arith.divf %97, %98 : vector<4x128xf32>
      %cst_56 = arith.constant dense<0.000000e+00> : vector<128xf32>
      %100 = vector.multi_reduction <add>, %99, %cst_56 [0] : vector<4x128xf32> to vector<128xf32>
      %101 = vector.shape_cast %100 : vector<128xf32> to vector<1x128xf32>
      %cst_57 = arith.constant 0.000000e+00 : f32
      %102 = vector.broadcast %cst_57 : f32 to vector<3x128xf32>
      %103 = tpu.concatenate %94, %101, %102 in 0 : vector<4x128xf32>, vector<1x128xf32>, vector<3x128xf32> -> vector<8x128xf32>
      %104 = vector.shape_cast %103 : vector<8x128xf32> to vector<1x8x128xf32>
      %c0_58 = arith.constant 0 : index
      %c0_59 = arith.constant 0 : index
      %c0_60 = arith.constant 0 : index
      %105 = vector.load %arg9[%c0_58, %c0_59, %c0_60] : memref<1x8x128xf32, #tpu.memory_space<vmem>>, vector<1x8x128xf32>
      tpu.vector_store %arg9[%c0_58, %c0_59, %c0_60], %104 {strides = array<i32>} : memref<1x8x128xf32, #tpu.memory_space<vmem>>, vector<1x8x128xf32>,
    } else {
    }
    %c0 = arith.constant 0 : index
    %c0_1 = arith.constant 0 : index
    %3 = vector.load %arg2[%c0, %c0_1] : memref<32x128xf32, #tpu.memory_space<vmem>>, vector<32x128xf32>
    %c0_2 = arith.constant 0 : index
    %c0_3 = arith.constant 0 : index
    %4 = vector.load %arg4[%c0_2, %c0_3] : memref<32x1xi32, #tpu.memory_space<vmem>>, vector<32x1xi32>
    %5 = tpu.iota {dimensions = array<i32: 1>} : vector<32x128xi32>
    %6 = vector.broadcast %4 : vector<32x1xi32> to vector<32x128xi32>
    %7 = arith.cmpi eq, %5, %6 : vector<32x128xi32>
    %cst = arith.constant dense<0xFF800000> : vector<32xf32>
    %8 = vector.multi_reduction <maximumf>, %3, %cst [1] : vector<32x128xf32> to vector<32xf32>
    %9 = vector.shape_cast %8 : vector<32xf32> to vector<32x1xf32>
    %10 = vector.broadcast %9 : vector<32x1xf32> to vector<32x128xf32>
    %11 = arith.subf %3, %10 : vector<32x128xf32>
    %12 = math.exp %11 : vector<32x128xf32>
    %cst_4 = arith.constant dense<0.000000e+00> : vector<32xf32>
    %13 = vector.multi_reduction <add>, %12, %cst_4 [1] : vector<32x128xf32> to vector<32xf32>
    %14 = vector.shape_cast %13 : vector<32xf32> to vector<32x1xf32>
    %15 = math.log %14 : vector<32x1xf32>
    %16 = vector.broadcast %15 : vector<32x1xf32> to vector<32x128xf32>
    %17 = arith.subf %11, %16 : vector<32x128xf32>
    %c0_5 = arith.constant 0 : index
    %c0_6 = arith.constant 0 : index
    %c0_7 = arith.constant 0 : index
    %18 = vector.load %arg6[%c0_5, %c0_6, %c0_7] : memref<1x1x128xf32, #tpu.memory_space<vmem>>, vector<1x1x128xf32>
    %cst_8 = arith.constant 0.000000e+00 : f32
    %19 = vector.broadcast %cst_8 : f32 to vector<32x128xf32>
    %20 = arith.subf %19, %17 : vector<32x128xf32>
    %cst_9 = arith.constant 0.000000e+00 : f32
    %21 = vector.broadcast %cst_9 : f32 to vector<32x128xf32>
    %22 = arith.select %7, %20, %21 : vector<32x128xi1>, vector<32x128xf32>
    %cst_10 = arith.constant dense<0.000000e+00> : vector<128xf32>
    %23 = vector.multi_reduction <add>, %22, %cst_10 [0] : vector<32x128xf32> to vector<128xf32>
    %24 = vector.shape_cast %23 : vector<128xf32> to vector<1x128xf32>
    %25 = vector.shape_cast %24 : vector<1x128xf32> to vector<1x1x128xf32>
    %26 = arith.addf %18, %25 : vector<1x1x128xf32>
    %c0_11 = arith.constant 0 : index
    %c0_12 = arith.constant 0 : index
    %c0_13 = arith.constant 0 : index
    %27 = vector.load %arg6[%c0_11, %c0_12, %c0_13] : memref<1x1x128xf32, #tpu.memory_space<vmem>>, vector<1x1x128xf32>
    tpu.vector_store %arg6[%c0_11, %c0_12, %c0_13], %26 {strides = array<i32>} : memref<1x1x128xf32, #tpu.memory_space<vmem>>, vector<1x1x128xf32>,
    %c0_14 = arith.constant 0 : index
    %c0_15 = arith.constant 0 : index
    %28 = vector.load %arg3[%c0_14, %c0_15] : memref<32x128xf32, #tpu.memory_space<vmem>>, vector<32x128xf32>
    %cst_16 = arith.constant dense<0xFF800000> : vector<32xf32>
    %29 = vector.multi_reduction <maximumf>, %28, %cst_16 [1] : vector<32x128xf32> to vector<32xf32>
    %30 = vector.shape_cast %29 : vector<32xf32> to vector<32x1xf32>
    %31 = vector.broadcast %30 : vector<32x1xf32> to vector<32x128xf32>
    %32 = arith.subf %28, %31 : vector<32x128xf32>
    %33 = math.exp %32 : vector<32x128xf32>
    %cst_17 = arith.constant dense<0.000000e+00> : vector<32xf32>
    %34 = vector.multi_reduction <add>, %33, %cst_17 [1] : vector<32x128xf32> to vector<32xf32>
    %35 = vector.shape_cast %34 : vector<32xf32> to vector<32x1xf32>
    %36 = math.log %35 : vector<32x1xf32>
    %37 = vector.broadcast %36 : vector<32x1xf32> to vector<32x128xf32>
    %38 = arith.subf %32, %37 : vector<32x128xf32>
    %39 = tpu.reciprocal %14 : vector<32x1xf32> -> vector<32x1xf32>
    %40 = vector.broadcast %39 : vector<32x1xf32> to vector<32x128xf32>
    %41 = arith.mulf %12, %40 : vector<32x128xf32>
    %c0_18 = arith.constant 0 : index
    %c0_19 = arith.constant 0 : index
    %c0_20 = arith.constant 0 : index
    %42 = vector.load %arg7[%c0_18, %c0_19, %c0_20] : memref<1x1x128xf32, #tpu.memory_space<vmem>>, vector<1x1x128xf32>
    %cst_21 = arith.constant 0.000000e+00 : f32
    %43 = vector.broadcast %cst_21 : f32 to vector<32x128xf32>
    %44 = arith.subf %43, %38 : vector<32x128xf32>
    %cst_22 = arith.constant 0.000000e+00 : f32
    %45 = vector.broadcast %cst_22 : f32 to vector<32x128xf32>
    %46 = arith.select %7, %44, %45 : vector<32x128xi1>, vector<32x128xf32>
    %cst_23 = arith.constant dense<0.000000e+00> : vector<128xf32>
    %47 = vector.multi_reduction <add>, %46, %cst_23 [0] : vector<32x128xf32> to vector<128xf32>
    %48 = vector.shape_cast %47 : vector<128xf32> to vector<1x128xf32>
    %49 = vector.shape_cast %48 : vector<1x128xf32> to vector<1x1x128xf32>
    %50 = arith.addf %42, %49 : vector<1x1x128xf32>
    %c0_24 = arith.constant 0 : index
    %c0_25 = arith.constant 0 : index
    %c0_26 = arith.constant 0 : index
    %51 = vector.load %arg7[%c0_24, %c0_25, %c0_26] : memref<1x1x128xf32, #tpu.memory_space<vmem>>, vector<1x1x128xf32>
    tpu.vector_store %arg7[%c0_24, %c0_25, %c0_26], %50 {strides = array<i32>} : memref<1x1x128xf32, #tpu.memory_space<vmem>>, vector<1x1x128xf32>,
    %c0_27 = arith.constant 0 : index
    %c0_28 = arith.constant 0 : index
    %c0_29 = arith.constant 0 : index
    %52 = vector.load %arg8[%c0_27, %c0_28, %c0_29] : memref<1x1x128xf32, #tpu.memory_space<vmem>>, vector<1x1x128xf32>
    %53 = arith.subf %17, %38 : vector<32x128xf32>
    %54 = arith.mulf %41, %53 : vector<32x128xf32>
    %cst_30 = arith.constant dense<0.000000e+00> : vector<128xf32>
    %55 = vector.multi_reduction <add>, %54, %cst_30 [0] : vector<32x128xf32> to vector<128xf32>
    %56 = vector.shape_cast %55 : vector<128xf32> to vector<1x128xf32>
    %57 = vector.shape_cast %56 : vector<1x128xf32> to vector<1x1x128xf32>
    %58 = arith.addf %52, %57 : vector<1x1x128xf32>
    %c0_31 = arith.constant 0 : index
    %c0_32 = arith.constant 0 : index
    %c0_33 = arith.constant 0 : index
    %59 = vector.load %arg8[%c0_31, %c0_32, %c0_33] : memref<1x1x128xf32, #tpu.memory_space<vmem>>, vector<1x1x128xf32>
    tpu.vector_store %arg8[%c0_31, %c0_32, %c0_33], %58 {strides = array<i32>} : memref<1x1x128xf32, #tpu.memory_space<vmem>>, vector<1x1x128xf32>,
    return
  }
  func.func @transform_0(%arg0: i32, %arg1: i32) -> (i32, i32) {
    %c1_i32 = arith.constant 1 : i32
    %0 = arith.muli %arg0, %c1_i32 : i32
    %1 = arith.addi %0, %arg1 : i32
    %c0_i32 = arith.constant 0 : i32
    %c0_i32_0 = arith.constant 0 : i32
    return %1, %c0_i32 : i32, i32
  }
  func.func @transform_1(%arg0: i32, %arg1: i32) -> (i32, i32) {
    %c1_i32 = arith.constant 1 : i32
    %0 = arith.muli %arg0, %c1_i32 : i32
    %1 = arith.addi %0, %arg1 : i32
    %c0_i32 = arith.constant 0 : i32
    %c0_i32_0 = arith.constant 0 : i32
    return %1, %c0_i32 : i32, i32
  }
  func.func @transform_2(%arg0: i32, %arg1: i32) -> (i32, i32) {
    %c1_i32 = arith.constant 1 : i32
    %0 = arith.muli %arg0, %c1_i32 : i32
    %1 = arith.addi %0, %arg1 : i32
    %c0_i32 = arith.constant 0 : i32
    %c0_i32_0 = arith.constant 0 : i32
    return %1, %c0_i32 : i32, i32
  }
  func.func @transform_3(%arg0: i32, %arg1: i32) -> (i32, i32) {
    %c0_i32 = arith.constant 0 : i32
    %c0_i32_0 = arith.constant 0 : i32
    %c0_i32_1 = arith.constant 0 : i32
    return %c0_i32, %c0_i32_0 : i32, i32
  }
  func.func @transform_4(%arg0: i32, %arg1: i32) -> (i32, i32, i32) {
    %c0_i32 = arith.constant 0 : i32
    %c0_i32_0 = arith.constant 0 : i32
    %c0_i32_1 = arith.constant 0 : i32
    return %arg0, %c0_i32, %c0_i32_0 : i32, i32, i32
  }
  func.func @transform_5(%arg0: i32, %arg1: i32) -> (i32, i32, i32) {
    %c0_i32 = arith.constant 0 : i32
    %c0_i32_0 = arith.constant 0 : i32
    %c0_i32_1 = arith.constant 0 : i32
    return %arg0, %c0_i32, %c0_i32_0 : i32, i32, i32
  }
  func.func @transform_6(%arg0: i32, %arg1: i32) -> (i32, i32, i32) {
    %c0_i32 = arith.constant 0 : i32
    %c0_i32_0 = arith.constant 0 : i32
    %c0_i32_1 = arith.constant 0 : i32
    return %arg0, %c0_i32, %c0_i32_0 : i32, i32, i32
  }
  func.func @transform_7(%arg0: i32, %arg1: i32) -> (i32, i32, i32) {
    %c0_i32 = arith.constant 0 : i32
    %c0_i32_0 = arith.constant 0 : i32
    %c0_i32_1 = arith.constant 0 : i32
    return %arg0, %c0_i32, %c0_i32_0 : i32, i32, i32
  }
}

</mosaic_0001>

<bundles_post_ra>
// kernel: tpu_custom_call.1
= control target key start
LH: loop header
LB: loop body
LE: loop exit
PB: predicated region body
PF: predicated region fallthrough
CT: control target
= control target key end

     0   :  { %13 = vsyncpa [#allocation3], 0  ;;  %s1032_s0 = inlined_call_operand.vmem [shape: f32[32,128], index: 0, kind: input, shape index: {}]   ;;  %s1033_s1 = inlined_call_operand.hbm [shape: f32[32,128], index: 1, kind: input, shape index: {}]   ;;  %s1034_s2 = inlined_call_operand.vmem [shape: s32[32,1], index: 2, kind: input, shape index: {}]   ;;  %s1035_s3 = inlined_call_operand.hbm [shape: f32[4,128], index: 3, kind: input, shape index: {}]   ;;  %s1036_s4 = inlined_call_operand.hbm [shape: f32[1,1,128], index: 4, kind: output, shape index: {0}]   ;;  %s1037_s5 = inlined_call_operand.hbm [shape: f32[1,1,128], index: 5, kind: output, shape index: {1}]   ;;  %s1038_s6 = inlined_call_operand.hbm [shape: f32[1,1,128], index: 6, kind: output, shape index: {2}]   ;;  %s1039_s7 = inlined_call_operand.hbm [shape: f32[1,8,128], index: 7, kind: output, shape index: {3}]  }
   0x1   :  { %14 = vsyncpa [#allocation6], 0 }
   0x2   :  { %15 = vsyncpa [#allocation4], 0 }
   0x3   :  { %16 = vsyncpa [#allocation9], 0 }
   0x4   :  { %17 = vsyncpa [#allocation12], 0  ;;  %s36_s26 = sshll.u32 %s1033_s1, 4  ;;  %s716_s27 = smov [#allocation2]   ;;  %s37_s26 = int_to_ptr.hbm [resolvable:$true] %s36_s26 }
   0x5   :  { %s38_s28 = sshll.u32 %s716_s27, 4  ;;  %s60_s8 = sshll.u32 %s1035_s3, 4  ;;  %s39_s28 = int_to_ptr.vmem [resolvable:$true] %s38_s28  ;;  %s61_s8 = int_to_ptr.hbm [resolvable:$true] %s60_s8 }
   0x6   :  { %s717_s9 = smov 128   ;;  %s718_s10 = smov 8  }
   0x7   :  { %44 = dma.hbm_to_vmem [thread:$0]  %s37_s26, 512, %s39_s28, [#allocation3], %s717_s9, %s717_s9, %s718_s10  }
   0x8   :  { %s719_s11 = smov [#allocation5]  }
   0x9   :  { %s62_s12 = sshll.u32 %s719_s11, 4  ;;  %s63_s12 = int_to_ptr.vmem [resolvable:$true] %s62_s12 }
   0xa   :  { %65 = dma.hbm_to_vmem [thread:$0]  %s61_s8, 64, %s63_s12, [#allocation6]  }
   0xb   :  { %706 = dma.done.wait [#allocation3], 512  }
   0xc   :  { %707 = vsyncadd [#allocation3], 4294966784 }
   0xd   :  { %708 = dma.done.wait [#allocation6], 64  }
   0xe   :  { %709 = vsyncadd [#allocation6], 4294967232  ;;  %vm112_vm0 = vcmask 1043456   ;;  %v191_v0 = vld [vmem:[%s1032_s0 + $0x18] sm:$0xff]  ;;  %v189_v1 = vld [vmem:[%s1032_s0 + $0x8] sm:$0xff]  ;;  %v720_v15 = vmov 0  }
   0xf   :  { %v779_v2 = vld [vmem:[#allocation5] sm:$0xf]  ;;  %220 = vmax.xlane.f32.xlu2 %v191_v0  ;;  %216 = vmax.xlane.f32.xlu1 %v189_v1  ;;  %v190_v5 = vld [vmem:[%s1032_s0 + $0x10] sm:$0xff]  ;;  %v277_v7 = vld [vmem:[#allocation2 + $0x18] sm:$0xff]  ;;  %s436_s29 = sshll.u32 %s1037_s5, 4  ;;  %s723_s30 = smov [#allocation7]   ;;  %s437_s29 = int_to_ptr.hbm [resolvable:$true] %s436_s29 }
  0x10   :  { %v113_v3 = vsel %vm112_vm0, %v779_v2, -inf  ;;  %v274_v4 = vld [vmem:[#allocation2] sm:$0xff]  ;;  %v276_v8 = vld [vmem:[#allocation2 + $0x10] sm:$0xff]  ;;  %v275_v9 = vld [vmem:[#allocation2 + $0x8] sm:$0xff]  ;;  %507 = vset.pattern.permute.xlu0 %v720_v15  ;;  %509 = vset.pattern.permute.xlu2 %v720_v15  ;;  %s423_s8 = sshll.u32 %s723_s30, 4  ;;  %s425_s11 = sshll.u32 %s1036_s4, 4  ;;  %s424_s8 = int_to_ptr.vmem [resolvable:$true] %s423_s8  ;;  %s426_s11 = int_to_ptr.hbm [resolvable:$true] %s425_s11 }
  0x11   :  { %114 = vmax.xlane.f32.xlu0 %v113_v3  ;;  %v188_v6 = vld [vmem:[%s1032_s0] sm:$0xff]  ;;  %508 = vset.pattern.permute.xlu1 %v720_v15  ;;  %v194_v48 = vld [vmem:[%s1034_s2 + $0x10] sm:$0xff]  ;;  %v195_v50 = vld [vmem:[%s1034_s2 + $0x18] sm:$0xff]  ;;  %s724_s12 = smov [#allocation10]   ;;  %s447_s15 = sshll.u32 %s1038_s6, 4  ;;  %s448_s15 = int_to_ptr.hbm [resolvable:$true] %s447_s15 }
  0x12   :  { %v192_v49 = vld [vmem:[%s1034_s2] sm:$0xff]  ;;  %v193_v51 = vld [vmem:[%s1034_s2 + $0x8] sm:$0xff]  ;;  %s722_s2 = smov [#allocation8]   ;;  %s445_s1 = sshll.u32 %s724_s12, 4  ;;  %s446_s1 = int_to_ptr.vmem [resolvable:$true] %s445_s1 }
  0x13   :  { %s434_s26 = sshll.u32 %s722_s2, 4  ;;  %s726_s4 = smov [#allocation11]   ;;  %s435_s26 = int_to_ptr.vmem [resolvable:$true] %s434_s26 }
  0x14   :  { %s456_s5 = sshll.u32 %s726_s4, 4  ;;  %s458_s16 = sshll.u32 %s1039_s7, 4  ;;  %s457_s5 = int_to_ptr.vmem [resolvable:$true] %s456_s5  ;;  %s459_s16 = int_to_ptr.hbm [resolvable:$true] %s458_s16 }
  0x17   :  { %278 = vmax.xlane.f32.xlu2 %v274_v4  ;;  %218 = vmax.xlane.f32.xlu1 %v190_v5 }
  0x19   :  { %214 = vmax.xlane.f32.xlu0 %v188_v6 }
  0x1f   :  { %284 = vmax.xlane.f32.xlu2 %v277_v7  ;;  %282 = vmax.xlane.f32.xlu1 %v276_v8 }
  0x21   :  { %280 = vmax.xlane.f32.xlu0 %v275_v9 }
  0x82   :  { %v221_v10 = vpop.xlane.xlu2 %220  ;;  %v217_v11 = vpop.xlane.xlu1 %216 }
  0x83   :  { %v789_v12 = vsub.f32 %v189_v1, %v217_v11  ;;  %v805_v26 = vsub.f32 %v191_v0, %v221_v10 }
  0x84   :  { %v115_v13 = vpop.xlane.xlu0 %114 }
  0x85   :  { %v228_v14 = vmul.f32 1.442695, %v789_v12  ;;  %v793_v18 = vsub.f32 %v779_v2, %v115_v13  ;;  %v232_v29 = vmul.f32 1.442695, %v805_v26 }
  0x87   :  { %510 = vpow2.f32 %v228_v14  ;;  %v117_v28 = vmul.f32 1.442695, %v793_v18 }
  0x8a   :  { %v279_v16 = vpop.xlane.xlu2 %278  ;;  %v219_v17 = vpop.xlane.xlu1 %218 }
  0x8b   :  { %v795_v19 = vsub.f32 %v274_v4, %v279_v16  ;;  %v797_v20 = vsub.f32 %v190_v5, %v219_v17 }
  0x8c   :  { %v215_v21 = vpop.xlane.xlu0 %214 }
  0x8d   :  { %v799_v22 = vsub.f32 %v188_v6, %v215_v21  ;;  %v290_v23 = vmul.f32 1.442695, %v795_v19  ;;  %v230_v24 = vmul.f32 1.442695, %v797_v20  ;;  %v803_v25 = vpop.eup %510 }
  0x8e   :  { %236 = vadd.xlane.f32.xlu2 %v803_v25 }
  0x8f   :  { %v226_v27 = vmul.f32 1.442695, %v799_v22  ;;  %512 = vpow2.f32 %v290_v23 }
  0x90   :  { %514 = vpow2.f32 %v230_v24 }
  0x91   :  { %516 = vpow2.f32 %v226_v27 }
  0x92   :  { %v285_v30 = vpop.xlane.xlu2 %284  ;;  %518 = vpow2.f32 %v117_v28  ;;  %v283_v33 = vpop.xlane.xlu1 %282 }
  0x93   :  { %v811_v31 = vsub.f32 %v277_v7, %v285_v30  ;;  %520 = vpow2.f32 %v232_v29  ;;  %v821_v39 = vsub.f32 %v276_v8, %v283_v33 }
  0x94   :  { %v281_v32 = vpop.xlane.xlu0 %280 }
  0x95   :  { %v513_v34 = vpop.eup %512  ;;  %v296_v35 = vmul.f32 1.442695, %v811_v31  ;;  %v816_v37 = vsub.f32 %v275_v9, %v281_v32  ;;  %v294_v42 = vmul.f32 1.442695, %v821_v39 }
  0x96   :  { %v814_v36 = vpop.eup %514  ;;  %298 = vadd.xlane.f32.xlu2 %v513_v34 }
  0x97   :  { %v818_v38 = vpop.eup %516  ;;  %522 = vpow2.f32 %v296_v35  ;;  %238 = vadd.xlane.f32.xlu0 %v814_v36  ;;  %v292_v41 = vmul.f32 1.442695, %v816_v37 }
  0x98   :  { %234 = vadd.xlane.f32.xlu1 %v818_v38  ;;  %v824_v40 = vpop.eup %518 }
  0x99   :  { %v828_v43 = vpop.eup %520  ;;  %v119_v44 = vsel %vm112_vm0, %v824_v40, 0.0  ;;  %524 = vpow2.f32 %v292_v41 }
  0x9a   :  { %526 = vpow2.f32 %v294_v42 }
  0x9d   :  { %v523_v45 = vpop.eup %522 }
  0x9e   :  { %304 = vadd.xlane.f32.xlu2 %v523_v45 }
  0x9f   :  { %120 = vadd.xlane.f32.xlu0 %v119_v44  ;;  %v525_v46 = vpop.eup %524 }
  0xa0   :  { %240 = vadd.xlane.f32.xlu1 %v828_v43  ;;  %v527_v47 = vpop.eup %526 }
  0xa7   :  { %300 = vadd.xlane.f32.xlu0 %v525_v46 }
  0xa8   :  { %302 = vadd.xlane.f32.xlu1 %v527_v47 }
  0xb6   :  { %205 = vperm.xlu2 %509, %v194_v48  }
  0xbb   :  { %199 = vperm.xlu0 %507, %v192_v49  }
  0xbe   :  { %208 = vperm.xlu2 %509, %v195_v50  }
  0xc1   :  { %202 = vperm.xlu1 %508, %v193_v51  }
 0x101   :  { %v237_v52 = vpop.xlane.xlu2 %236 }
 0x102   :  { %528 = vrcp.f32 %v237_v52  ;;  %v343_v59 = vand.u32 2147483648, %v237_v52  ;;  %vm337_vm1 = vweird.f32 %v237_v52  ;;  %v341_v63 = vand.u32 2147483647, %v237_v52 }
 0x103   :  { %530 = vlog2.f32 %v237_v52 }
 0x104   :  { %v862_v4 = vor.u32 1.1754944e-38, %v343_v59  ;;  %vm904_vm8 = vcmp.eq.f32.partialorder %v341_v63, 8.507059e+37 }
 0x108   :  { %v845_v53 = vpop.eup %528 }
 0x109   :  { %v333_v54 = vmul.f32 %v845_v53, %v237_v52  ;;  %v299_v55 = vpop.xlane.xlu2 %298  ;;  %v531_v60 = vpop.eup %530  ;;  %vm338_vm2 = vweird.f32 %v845_v53 }
 0x10a   :  { %v848_v56 = vpop.xlane.xlu0 %238  ;;  %v245_v14 = vmul.f32 0.6931472, %v531_v60  ;;  %vm895_vm6 = vmor %vm337_vm1, %vm338_vm2 }
 0x10b   :  { %v850_v57 = vpop.xlane.xlu1 %234  ;;  %532 = vrcp.f32 %v848_v56  ;;  %v334_v58 = vsub.f32 1.0, %v333_v54  ;;  %v357_v6 = vand.u32 2147483648, %v848_v56  ;;  %v355_v16 = vand.u32 2147483647, %v848_v56 }
 0x10c   :  { %534 = vrcp.f32 %v850_v57  ;;  %v327_v10 = vand.u32 2147483647, %v850_v57  ;;  %v329_v13 = vand.u32 2147483648, %v850_v57  ;;  %vm351_vm3 = vweird.f32 %v848_v56 }
 0x10d   :  { %536 = vlog2.f32 %v299_v55  ;;  %v335_v62 = vmul.f32 %v845_v53, %v334_v58  ;;  %v882_v23 = vor.u32 1.1754944e-38, %v357_v6  ;;  %vm323_vm4 = vweird.f32 %v850_v57 }
 0x10e   :  { %538 = vlog2.f32 %v848_v56  ;;  %vm887_vm5 = vcmp.eq.f32.partialorder %v327_v10, 8.507059e+37  ;;  %v330_v33 = vor.u32 1.1754944e-38, %v329_v13  ;;  %v902_v35 = vsub.f32 %v789_v12, %v245_v14 }
 0x10f   :  { %540 = vlog2.f32 %v850_v57  ;;  %v877_v15 = vadd.f32 %v845_v53, %v335_v62  ;;  %vm909_vm10 = vcmp.eq.f32.partialorder %v355_v16, 8.507059e+37 }
 0x110   :  { %v256_v59 = vsub.f32 0.0, %v902_v35 }
 0x111   :  { %v854_v61 = vpop.eup %532  ;;  %v305_v0 = vpop.xlane.xlu2 %304  ;;  %v340_v12 = vsel %vm895_vm6, %v845_v53, %v877_v15 }
 0x112   :  { %v857_v1 = vpop.xlane.xlu0 %120  ;;  %v860_v3 = vpop.eup %534  ;;  %v347_v5 = vmul.f32 %v854_v61, %v848_v56  ;;  %542 = vlog2.f32 %v305_v0  ;;  %vm352_vm9 = vweird.f32 %v854_v61 }
 0x113   :  { %v867_v7 = vpop.xlane.xlu1 %240  ;;  %v537_v8 = vpop.eup %536  ;;  %v319_v9 = vmul.f32 %v860_v3, %v850_v57  ;;  %544 = vrcp.f32 %v857_v1  ;;  %vm324_vm7 = vweird.f32 %v860_v3  ;;  %vm130_vm11 = vweird.f32 %v857_v1  ;;  %vm945_vm15 = vmor %vm351_vm3, %vm352_vm9 }
 0x114   :  { %v348_v11 = vsub.f32 1.0, %v347_v5  ;;  %546 = vrcp.f32 %v867_v7  ;;  %v307_v21 = vmul.f32 0.6931472, %v537_v8  ;;  %v539_v24 = vpop.eup %538  ;;  %v369_v34 = vand.u32 2147483647, %v867_v7  ;;  %vm928_vm12 = vmor %vm323_vm4, %vm324_vm7 }
 0x115   :  { %v320_v17 = vsub.f32 1.0, %v319_v9  ;;  %548 = vlog2.f32 %v867_v7  ;;  %v541_v30 = vpop.eup %540  ;;  %v371_v45 = vand.u32 2147483648, %v867_v7  ;;  %v247_v50 = vmul.f32 0.6931472, %v539_v24 }
 0x116   :  { %v349_v27 = vmul.f32 %v854_v61, %v348_v11  ;;  %v920_v48 = vsub.f32 %v795_v19, %v307_v21  ;;  %v243_v19 = vmul.f32 0.6931472, %v541_v30  ;;  %vm365_vm13 = vweird.f32 %v867_v7 }
 0x117   :  { %v321_v28 = vmul.f32 %v860_v3, %v320_v17  ;;  %vm935_vm14 = vcmp.eq.f32.partialorder %v369_v34, 8.507059e+37  ;;  %v134_v60 = vand.u32 2147483647, %v857_v1  ;;  %v372_v0 = vor.u32 1.1754944e-38, %v371_v45 }
 0x118   :  { %v543_v41 = vpop.eup %542  ;;  %v350_v54 = vadd.f32 %v854_v61, %v349_v27  ;;  %v136_v5 = vand.u32 2147483648, %v857_v1  ;;  %v950_v9 = vsub.f32 %v797_v20, %v247_v50  ;;  %v959_v56 = vsub.f32 %v799_v22, %v243_v19 }
 0x119   :  { %v545_v47 = vpop.eup %544  ;;  %v322_v49 = vadd.f32 %v860_v3, %v321_v28  ;;  %v313_v57 = vmul.f32 0.6931472, %v543_v41  ;;  %vm961_vm3 = vcmp.eq.f32.partialorder %v134_v60, 8.507059e+37  ;;  %v206_v50 = vpop.permute.xlu2 %205 }
 0x11a   :  { %v301_v46 = vpop.xlane.xlu0 %300  ;;  %v547_v52 = vpop.eup %546  ;;  %v126_v53 = vmul.f32 %v545_v47, %v857_v1  ;;  %v354_v13 = vsel %vm945_vm15, %v854_v61, %v350_v54  ;;  %vm131_vm2 = vweird.f32 %v545_v47  ;;  %v137_v27 = vor.u32 1.1754944e-38, %v136_v5 }
 0x11b   :  { %550 = vlog2.f32 %v301_v46  ;;  %v303_v51 = vpop.xlane.xlu1 %302  ;;  %v361_v58 = vmul.f32 %v547_v52, %v867_v7  ;;  %v549_v62 = vpop.eup %548  ;;  %vm366_vm1 = vweird.f32 %v547_v52  ;;  %v326_v10 = vsel %vm928_vm12, %v860_v3, %v322_v49 }
 0x11c   :  { %552 = vlog2.f32 %v303_v51  ;;  %v127_v63 = vsub.f32 1.0, %v126_v53  ;;  %v249_v16 = vmul.f32 0.6931472, %v549_v62  ;;  %v331_v20 = vsel %vm887_vm5, %v330_v33, %v326_v10  ;;  %vm972_vm4 = vmor %vm365_vm13, %vm366_vm1 }
 0x11d   :  { %v362_v8 = vsub.f32 1.0, %v361_v58  ;;  %v968_v21 = vsub.f32 %v811_v31, %v313_v57  ;;  %v359_v29 = vsel %vm909_vm10, %v882_v23, %v354_v13  ;;  %vm132_vm5 = vmor %vm130_vm11, %vm131_vm2  ;;  %v345_v31 = vsel %vm904_vm8, %v862_v4, %v340_v12 }
 0x11e   :  { %v128_v11 = vmul.f32 %v545_v47, %v127_v63  ;;  %v374_v33 = vmul.f32 %v818_v38, %v331_v20  ;;  %v399_v34 = vsub.f32 %v959_v56, %v920_v48  ;;  %v253_v23 = vsub.f32 %v805_v26, %v249_v16 }
 0x11f   :  { %v363_v15 = vmul.f32 %v547_v52, %v362_v8  ;;  %v375_v38 = vmul.f32 %v803_v25, %v345_v31  ;;  %v721_v25 = vmov 0.0   ;;  %v196_v54 = vlaneseq }
 0x120   :  { %v129_v24 = vadd.f32 %v545_v47, %v128_v11  ;;  %109 = vst [vmem:[#allocation8] sm:$0x1] %v721_v25  ;;  %v255_v63 = vsub.f32 0.0, %v959_v56  ;;  %v257_v8 = vsub.f32 0.0, %v950_v9  ;;  %v382_v56 = vsub.f32 0.0, %v968_v21 }
 0x121   :  { %v551_v14 = vpop.eup %550  ;;  %v364_v28 = vadd.f32 %v547_v52, %v363_v15  ;;  %108 = vst [vmem:[#allocation7] sm:$0x1] %v721_v25  ;;  %v197_v19 = vand.u32 127, %v196_v54  ;;  %v209_v57 = vpop.permute.xlu2 %208  ;;  %vm185_vm15 = vcmask 1044480  }
 0x122   :  { %v553_v3 = vpop.eup %552  ;;  %v309_v22 = vmul.f32 0.6931472, %v551_v14  ;;  %v133_v32 = vsel %vm132_vm5, %v545_v47, %v129_v24  ;;  %v403_v47 = vmul.f32 %v399_v34, %v374_v33  ;;  %110 = vst [vmem:[#allocation10] sm:$0x1] %v721_v25 }
 0x123   :  { %v311_v30 = vmul.f32 0.6931472, %v553_v3  ;;  %v368_v44 = vsel %vm972_vm4, %v547_v52, %v364_v28  ;;  %v138_v45 = vsel %vm961_vm3, %v137_v27, %v133_v32  ;;  %vm212_vm7 = vcmp.eq.s32.totalorder %v197_v19, %v206_v50 }
 0x124   :  { %v315_v7 = vsub.f32 %v816_v37, %v309_v22  ;;  %v373_v4 = vsel %vm935_vm14, %v372_v0, %v368_v44  ;;  %v998_v37 = vmul.f32 %v824_v40, %v138_v45  ;;  %v402_v40 = vsub.f32 %v253_v23, %v968_v21 }
 0x125   :  { %v316_v41 = vsub.f32 %v821_v39, %v311_v30  ;;  %v376_v39 = vmul.f32 %v814_v36, %v359_v29  ;;  %v377_v46 = vmul.f32 %v828_v43, %v373_v4  ;;  %v379_v0 = vsub.f32 0.0, %v920_v48 }
 0x126   :  { %v400_v42 = vsub.f32 %v902_v35, %v315_v7  ;;  %v144_v12 = vsel %vm112_vm0, %v998_v37, 0.0  ;;  %v380_v6 = vsub.f32 0.0, %v315_v7  ;;  %vm213_vm9 = vcmp.eq.s32.totalorder %v197_v19, %v209_v57 }
 0x127   :  { %v401_v26 = vsub.f32 %v950_v9, %v316_v41  ;;  %145 = vadd.xlane.f32.xlu1 %v144_v12  ;;  %v406_v36 = vmul.f32 %v402_v40, %v377_v46  ;;  %v381_v62 = vsub.f32 0.0, %v316_v41  ;;  %v261_v20 = vsel %vm212_vm7, %v257_v8, 0.0 }
 0x128   :  { %v404_v49 = vmul.f32 %v400_v42, %v375_v38  ;;  %v258_v3 = vsub.f32 0.0, %v253_v23  ;;  %v386_v9 = vsel %vm213_vm9, %v382_v56, 0.0  ;;  %v378_v42 = vld [vmem:[#allocation8] sm:$0x1] }
 0x129   :  { %v405_v51 = vmul.f32 %v401_v26, %v376_v39  ;;  %v385_v48 = vsel %vm212_vm7, %v381_v62, 0.0  ;;  %v398_v28 = vld [vmem:[#allocation10] sm:$0x1]  ;;  %v254_v39 = vld [vmem:[#allocation7] sm:$0x1] }
 0x12a   :  { %v407_v52 = vadd.f32 %v404_v49, %v403_v47  ;;  %v262_v27 = vsel %vm213_vm9, %v258_v3, 0.0  ;;  %v495_v49 = vmul.f32 -1.442695, %v779_v2 }
 0x12c   :  { %v408_v55 = vadd.f32 %v407_v52, %v405_v51  ;;  %554 = vpow2.f32 %v495_v49 }
 0x12d   :  { %v200_v43 = vpop.permute.xlu0 %199 }
 0x12e   :  { %v409_v53 = vadd.f32 %v408_v55, %v406_v36  ;;  %vm210_vm6 = vcmp.eq.s32.totalorder %v197_v19, %v200_v43  ;;  %v725_v43 = vmov 128.0  }
 0x12f   :  { %v259_v11 = vsel %vm210_vm6, %v255_v63, 0.0  ;;  %v383_v13 = vsel %vm210_vm6, %v379_v0, 0.0 }
 0x130   :  { %v410_v58 = vrot.slane %v409_v53, 4 }
 0x132   :  { %v411_v60 = vadd.f32 %v410_v58, %v409_v53  ;;  %v555_v50 = vpop.eup %554 }
 0x133   :  { %v203_v5 = vpop.permute.xlu1 %202  ;;  %v161_v51 = vadd.f32 1.0, %v555_v50 }
 0x134   :  { %vm211_vm8 = vcmp.eq.s32.totalorder %v197_v19, %v203_v5  ;;  %v412_v10 = vrot.slane %v411_v60, 2 }
 0x135   :  { %v260_v14 = vsel %vm211_vm8, %v256_v59, 0.0  ;;  %v384_v15 = vsel %vm211_vm8, %v380_v6, 0.0  ;;  %556 = vrcp.f32 %v161_v51  ;;  %vm167_vm10 = vweird.f32 %v161_v51 }
 0x136   :  { %v263_v35 = vadd.f32 %v260_v14, %v259_v11  ;;  %v387_v16 = vadd.f32 %v384_v15, %v383_v13  ;;  %v413_v17 = vadd.f32 %v412_v10, %v411_v60  ;;  %v173_v36 = vand.u32 2147483648, %v161_v51 }
 0x137   :  { %v171_v53 = vand.u32 2147483647, %v161_v51  ;;  %558 = vrcp.f32 %v725_v43  ;;  %v140_v13 = vsub.f32 0.0, %v998_v37 }
 0x138   :  { %v264_v61 = vadd.f32 %v263_v35, %v261_v20  ;;  %v388_v22 = vadd.f32 %v387_v16, %v385_v48  ;;  %v414_v24 = vrot.slane %v413_v17, 1  ;;  %v174_v19 = vor.u32 1.1754944e-38, %v173_v36 }
 0x139   :  { %vm172_vm13 = vcmp.eq.f32.partialorder %v171_v53, 8.507059e+37  ;;  %560 = vlog2.f32 %v857_v1 }
 0x13a   :  { %v265_v30 = vadd.f32 %v264_v61, %v262_v27  ;;  %v389_v29 = vadd.f32 %v388_v22, %v386_v9  ;;  %v415_v31 = vadd.f32 %v414_v24, %v413_v17 }
 0x13b   :  { %v557_v40 = vpop.eup %556 }
 0x13c   :  { %v266_v7 = vrot.slane %v265_v30, 4  ;;  %v390_v32 = vrot.slane %v389_v29, 4  ;;  %v416_v33 = vadd.f32 %v415_v31, %v398_v28  ;;  %v163_v52 = vmul.f32 %v557_v40, %v161_v51 }
 0x13d   :  { %vm168_vm11 = vweird.f32 %v557_v40  ;;  %v559_v2 = vpop.eup %558 }
 0x13e   :  { %v267_v34 = vadd.f32 %v266_v7, %v265_v30  ;;  %v391_v41 = vadd.f32 %v390_v32, %v389_v29  ;;  %417 = vst [vmem:[#allocation10] sm:$0x1] %v416_v33  ;;  %v164_v25 = vsub.f32 1.0, %v163_v52  ;;  %vm169_vm12 = vmor %vm167_vm10, %vm168_vm11  ;;  %v148_v62 = vmul.f32 128.0, %v559_v2 }
 0x13f   :  { %v561_v6 = vpop.eup %560  ;;  %vm152_vm14 = vweird.f32 %v559_v2 }
 0x140   :  { %v268_v44 = vrot.slane %v267_v34, 2  ;;  %v392_v45 = vrot.slane %v391_v41, 2  ;;  %v165_v54 = vmul.f32 %v557_v40, %v164_v25  ;;  %v149_v63 = vsub.f32 1.0, %v148_v62 }
 0x141   :  { %v123_v11 = vmul.f32 0.6931472, %v561_v6 }
 0x142   :  { %v269_v21 = vadd.f32 %v268_v44, %v267_v34  ;;  %v393_v23 = vadd.f32 %v392_v45, %v391_v41  ;;  %v166_v55 = vadd.f32 %v557_v40, %v165_v54  ;;  %v150_v5 = vmul.f32 %v559_v2, %v149_v63 }
 0x143   :  { %v124_v35 = vsub.f32 %v793_v18, %v123_v11 }
 0x144   :  { %v394_v4 = vrot.slane %v393_v23, 1  ;;  %v270_v38 = vrot.slane %v269_v21, 1  ;;  %v170_v58 = vsel %vm169_vm12, %v557_v40, %v166_v55  ;;  %v151_v10 = vadd.f32 %v559_v2, %v150_v5 }
 0x145   :  { %v175_v59 = vsel %vm172_vm13, %v174_v19, %v170_v58  ;;  %v141_v17 = vmul.f32 %v140_v13, %v124_v35 }
 0x146   :  { %v395_v26 = vadd.f32 %v394_v4, %v393_v23  ;;  %v271_v46 = vadd.f32 %v270_v38, %v269_v21  ;;  %v177_v60 = vsel %vm112_vm0, %v175_v59, 0.0  ;;  %v153_v15 = vsel %vm152_vm14, %v559_v2, %v151_v10 }
 0x147   :  { %v178_v57 = vrot.slane %v177_v60, 4  ;;  %v142_v3 = vmul.f32 0.20609929, %v141_v17 }
 0x148   :  { %v396_v12 = vadd.f32 %v395_v26, %v378_v42  ;;  %v272_v47 = vadd.f32 %v271_v46, %v254_v39 }
 0x149   :  { %v179_v0 = vadd.f32 %v178_v57, %v177_v60 }
 0x14a   :  { %397 = vst [vmem:[#allocation8] sm:$0x1] %v396_v12 }
 0x14b   :  { %439 = dma.vmem_to_hbm [thread:$0]  %s435_s26, 16, %s437_s29, [#allocation9]   ;;  %273 = vst [vmem:[#allocation7] sm:$0x1] %v272_v47  ;;  %v180_v8 = vrot.slane %v179_v0, 2 }
 0x14c   :  { %428 = dma.vmem_to_hbm [thread:$0]  %s424_s8, 16, %s426_s11, [#allocation4]  }
 0x14d   :  { %450 = dma.vmem_to_hbm [thread:$0]  %s446_s1, 16, %s448_s15, [#allocation9]   ;;  %v181_v14 = vadd.f32 %v180_v8, %v179_v0 }
 0x14f   :  { %v182_v56 = vrot.slane %v181_v14, 1 }
 0x151   :  { %v183_v61 = vadd.f32 %v182_v56, %v181_v14 }
 0x19a   :  { %v146_v16 = vpop.xlane.xlu1 %145 }
 0x19b   :  { %v154_v20 = vmul.f32 %v153_v15, %v146_v16 }
 0x19d   :  { %v155_v1 = vsub.f32 %v998_v37, %v154_v20 }
 0x19f   :  { %v156_v48 = vmul.f32 %v155_v1, %v155_v1 }
 0x1a1   :  { %v157_v22 = vsub.f32 %v142_v3, %v156_v48 }
 0x1a3   :  { %v184_v24 = vsel %vm112_vm0, %v157_v22, %v183_v61 }
 0x1a4   :  { %v186_v18 = vsel %vm185_vm15, %v184_v24, 0.0 }
 0x1a5   :  { %187 = vst [vmem:[#allocation11] sm:$0xff] %v186_v18 }
 0x1a6   :  { %461 = dma.vmem_to_hbm [thread:$0]  %s457_s5, 128, %s459_s16, [#allocation12]  }
 0x1a7   :  { %710 = dma.done.wait [#allocation4], 16  }
 0x1a8   :  { %711 = vsyncadd [#allocation4], 4294967280 }
 0x1a9   :  { %712 = dma.done.wait [#allocation9], 32  }
 0x1aa   :  { %713 = vsyncadd [#allocation9], 4294967264 }
 0x1ab   :  { %714 = dma.done.wait [#allocation12], 128  }
 0x1ac   :  { %715 = vsyncadd [#allocation12], 4294967168 }
 0x1ad   :  { %478 = vsyncpa [#allocation3], 1 }
 0x1ae   :  { %479 = vsyncpa [#allocation6], 1 }
 0x1af   :  { %480 = vsyncpa [#allocation4], 1 }
 0x1b0   :  { %481 = vsyncpa [#allocation9], 1 }
 0x1b1   :  { %482 = vsyncpa [#allocation12], 1 }

</bundles_post_ra>
